<compile_context>
chip_gen: v7x
topology: tpu7x:2x2x1
jax: 0.10.0
libtpu: 0.0.40
codegen_flags: <defaults>
</compile_context>

<pallas_src>
import functools

import jax
import jax.numpy as jnp
from jax.experimental import pallas as pl
from jax.experimental.pallas import tpu as pltpu


# ------------------------------ fused kernel --------------------------------

def _decoder_seq_kernel(n_layers, hid_dim, *refs):
    """Fused T-step decoder.

    refs = (tok, h0, c0, emb,
            w_ih_0, w_hh_0, b_0, ..., w_ih_{L-1}, w_hh_{L-1}, b_{L-1},
            fc_w_t, fc_b,                      # inputs
            pred_out, state_out,               # outputs
            h_scr, c_scr, x_scr)               # VMEM scratch (carried over t)
    """
    L, H = n_layers, hid_dim
    n_in = 4 + 3 * L + 2
    in_refs, rest = refs[:n_in], refs[n_in:]
    tok_ref, h0_ref, c0_ref, emb_ref = in_refs[:4]
    layer_refs = in_refs[4:4 + 3 * L]
    fc_w_ref, fc_b_ref = in_refs[4 + 3 * L], in_refs[5 + 3 * L]
    pred_ref, state_ref = rest[0], rest[1]
    h_scr, c_scr, x_scr = rest[2], rest[3], rest[4]

    t = pl.program_id(0)
    B = x_scr.shape[0]
    V = emb_ref.shape[0]

    # ---- load initial recurrent state into the VMEM carry on step 0 ----
    @pl.when(t == 0)
    def _init():
        h_scr[...] = h0_ref[...]
        c_scr[...] = c0_ref[...]

    # ---- embedding gather: SMEM token scalars drive dynamic row slices ----
    for row in range(B):
        tok = tok_ref[t, row]
        # Guard against silent OOB VMEM reads (PyTorch would raise instead).
        tok = jnp.minimum(jnp.maximum(tok, 0), V - 1)
        x_scr[pl.ds(row, 1), :] = emb_ref[pl.ds(tok, 1), :]
    x = x_scr[...]                                            # [B, E] f32
    # TODO(synk): nn.Dropout is the identity here (eval-mode semantics).

    # ---- n_layers LSTM cells, unrolled; x and h/c never leave the chip ----
    for layer in range(L):
        w_ih_ref = layer_refs[3 * layer + 0]                  # [in, 4H] bf16
        w_hh_ref = layer_refs[3 * layer + 1]                  # [H, 4H]  bf16
        bias_ref = layer_refs[3 * layer + 2]                  # [1, 4H]  f32
        h_prev = h_scr[layer]                                 # [B, H]   f32
        c_prev = c_scr[layer]                                 # [B, H]   f32

        gates = (jnp.dot(x.astype(jnp.bfloat16), w_ih_ref[...],
                         preferred_element_type=jnp.float32)
                 + jnp.dot(h_prev.astype(jnp.bfloat16), w_hh_ref[...],
                           preferred_element_type=jnp.float32)
                 + bias_ref[...])                             # [B, 4H] f32

        # Two full-width EUP passes, then cheap slices (PyTorch order i,f,g,o).
        sig = jax.nn.sigmoid(gates)
        tgh = jnp.tanh(gates)
        i_g = sig[:, 0 * H:1 * H]
        f_g = sig[:, 1 * H:2 * H]
        g_g = tgh[:, 2 * H:3 * H]
        o_g = sig[:, 3 * H:4 * H]

        c_new = f_g * c_prev + i_g * g_g
        h_new = o_g * jnp.tanh(c_new)

        h_scr[layer] = h_new
        c_scr[layer] = c_new
        x = h_new                          # inter-layer dropout = identity

    # ---- fc head (lane-dense [B, V] output block per step) ----
    pred = jnp.dot(x.astype(jnp.bfloat16), fc_w_ref[...],
                   preferred_element_type=jnp.float32) + fc_b_ref[...]
    pred_ref[...] = pred.astype(pred_ref.dtype)

    # ---- write recurrent state back as one lane-dense [B, 2*L*H] slab ----
    @pl.when(t == pl.num_programs(0) - 1)
    def _writeback():
        for layer in range(L):
            state_ref[:, pl.ds(layer * H, H)] = h_scr[layer]
            state_ref[:, pl.ds((L + layer) * H, H)] = c_scr[layer]


# -------------------------------- wrappers ------------------------------------

def _resident_spec(arr):
    """Full-array block with a constant index_map: DMA'd once, VMEM-resident."""
    nd = arr.ndim
    return pl.BlockSpec(arr.shape, lambda t, _n=nd: (0,) * _n)


@jax.jit
def decoder_forward_seq(params, tokens, hidden, cell):
    """Fused multi-step decode (teacher-forced token sequence).

    tokens: [T, B] int32, hidden/cell: [n_layers, B, H] f32.
    Returns (predictions [T, B, output_dim], new_hidden, new_cell).
    """
    T, B = tokens.shape
    L, _, H = hidden.shape
    V = params["fc_w_t"].shape[1]
    E = params["embedding"].shape[1]

    inputs = [tokens.astype(jnp.int32), hidden, cell, params["embedding"]]
    in_specs = [pl.BlockSpec(memory_space=pltpu.MemorySpace.SMEM),   # tokens
                _resident_spec(hidden), _resident_spec(cell),
                _resident_spec(params["embedding"])]
    for layer in range(L):
        for w in (params["w_ih_t"][layer], params["w_hh_t"][layer],
                  params["b"][layer]):
            inputs.append(w)
            in_specs.append(_resident_spec(w))
    for w in (params["fc_w_t"], params["fc_b"]):
        inputs.append(w)
        in_specs.append(_resident_spec(w))

    kernel = functools.partial(_decoder_seq_kernel, L, H)
    preds, state = pl.pallas_call(
        kernel,
        grid=(T,),
        in_specs=in_specs,
        out_specs=(pl.BlockSpec((None, B, V), lambda t: (t, 0, 0)),
                   pl.BlockSpec((B, 2 * L * H), lambda t: (0, 0))),
        out_shape=(jax.ShapeDtypeStruct((T, B, V), jnp.float32),
                   jax.ShapeDtypeStruct((B, 2 * L * H), jnp.float32)),
        scratch_shapes=[pltpu.VMEM((L, B, H), jnp.float32),   # h carry
                        pltpu.VMEM((L, B, H), jnp.float32),   # c carry
                        pltpu.VMEM((B, E), jnp.float32)],     # gathered x
        compiler_params=pltpu.CompilerParams(
            dimension_semantics=("arbitrary",)),
    )(*inputs)

    new_h = state[:, :L * H].reshape(B, L, H).transpose(1, 0, 2)
    new_c = state[:, L * H:].reshape(B, L, H).transpose(1, 0, 2)
    return preds, new_h, new_c


def decoder_forward(params, token, hidden, cell):
    """Module-equivalent single step: token [B] -> (prediction [B, V], h, c)."""
    preds, new_h, new_c = decoder_forward_seq(
        params, token.reshape(1, -1).astype(jnp.int32), hidden, cell)
    return preds[0], new_h, new_c


# --------------------------- plain-JAX reference -----------------------------

def decoder_reference_step(params, token_b, hidden, cell):
    x = params["embedding"][token_b]                          # [B, E] f32
    L, _, H = hidden.shape
    new_h, new_c = [], []
    for l in range(L):
        gates = (jnp.dot(x.astype(jnp.bfloat16), params["w_ih_t"][l],
                         preferred_element_type=jnp.float32)
                 + jnp.dot(hidden[l].astype(jnp.bfloat16), params["w_hh_t"][l],
                           preferred_element_type=jnp.float32)
                 + params["b"][l])
        i = jax.nn.sigmoid(gates[:, 0 * H:1 * H])
        f = jax.nn.sigmoid(gates[:, 1 * H:2 * H])
        g = jnp.tanh(gates[:, 2 * H:3 * H])
        o = jax.nn.sigmoid(gates[:, 3 * H:4 * H])
        c_new = f * cell[l] + i * g
        h_new = o * jnp.tanh(c_new)
        new_h.append(h_new)
        new_c.append(c_new)
        x = h_new
    pred = jnp.dot(x.astype(jnp.bfloat16), params["fc_w_t"],
                   preferred_element_type=jnp.float32) + params["fc_b"]
    return pred, jnp.stack(new_h), jnp.stack(new_c)


def decoder_reference_seq(params, tokens, hidden, cell):
    preds = []
    for t in range(tokens.shape[0]):
        pred, hidden, cell = decoder_reference_step(params, tokens[t],
                                                    hidden, cell)
        preds.append(pred)
    return jnp.stack(preds), hidden, cell


# ------------------------- deterministic param init --------------------------

def init_params(key, output_dim, emb_dim, hid_dim, n_layers):
    k = 1.0 / float(hid_dim) ** 0.5
    keys = iter(jax.random.split(key, 1 + 4 * n_layers + 2))

    def u(kk, shape):
        return jax.random.uniform(kk, shape, jnp.float32, -k, k)

    params = {
        "embedding": jax.random.normal(next(keys), (output_dim, emb_dim),
                                       jnp.float32),
        "w_ih_t": [], "w_hh_t": [], "b": [],
    }
    for layer in range(n_layers):
        in_dim = emb_dim if layer == 0 else hid_dim
        # Weights pre-transposed to [in, out] and stored bf16 (halves DMA
        # bytes, feeds the native bf16 MXU); biases & gate math stay f32.
        params["w_ih_t"].append(
            u(next(keys), (in_dim, 4 * hid_dim)).astype(jnp.bfloat16))
        params["w_hh_t"].append(
            u(next(keys), (hid_dim, 4 * hid_dim)).astype(jnp.bfloat16))
        b_ih = u(next(keys), (1, 4 * hid_dim))
        b_hh = u(next(keys), (1, 4 * hid_dim))
        params["b"].append(b_ih + b_hh)
    params["fc_w_t"] = u(next(keys), (hid_dim, output_dim)).astype(jnp.bfloat16)
    params["fc_b"] = u(next(keys), (1, output_dim))
    return params


# ----------------------------------- main -------------------------------------

if __name__ == "__main__":
    OUTPUT_DIM = 128     # vocab; 128 keeps the fc / prediction block lane-dense
    EMB_DIM = 32
    HID_DIM = 32         # 4H = 128 -> gate slab is exactly one vreg wide
    N_LAYERS = 2         # 2*L*H = 128 -> state slab is one lane-dense vreg
    BATCH = 8
    T_STEPS = 6          # decode steps fused into one pallas_call

    root = jax.random.PRNGKey(0)
    k_par, k_tok, k_h, k_c = jax.random.split(root, 4)

    params = init_params(k_par, OUTPUT_DIM, EMB_DIM, HID_DIM, N_LAYERS)
    tokens = jax.random.randint(k_tok, (T_STEPS, BATCH), 0, OUTPUT_DIM,
                                dtype=jnp.int32)
    hidden = jax.random.normal(k_h, (N_LAYERS, BATCH, HID_DIM), jnp.float32)
    cell = jax.random.normal(k_c, (N_LAYERS, BATCH, HID_DIM), jnp.float32)

    # ---- fused T-step decode ----
    preds, new_hidden, new_cell = decoder_forward_seq(params, tokens, hidden,
                                                      cell)
    jax.block_until_ready((preds, new_hidden, new_cell))

    assert preds.shape == (T_STEPS, BATCH, OUTPUT_DIM)
    assert new_hidden.shape == (N_LAYERS, BATCH, HID_DIM)
    assert new_cell.shape == (N_LAYERS, BATCH, HID_DIM)

    # Tolerance: both paths use bf16 matmul operands with f32 accumulation;
    # remaining diffs come from accumulation order, EUP transcendental
    # implementations and rare bf16 rounding-boundary flips (<~1e-3).  Any
    # gate-order / slicing bug would produce O(0.1) errors.
    RTOL = ATOL = 2e-3
    ref_preds, ref_h, ref_c = decoder_reference_seq(params, tokens, hidden,
                                                    cell)
    for got, ref in ((preds, ref_preds), (new_hidden, ref_h),
                     (new_cell, ref_c)):
        err = float(jnp.max(jnp.abs(got - ref)))
        assert jnp.allclose(got, ref, rtol=RTOL, atol=ATOL), err

    # ---- module-equivalent single step (Decoder.forward semantics) ----
    pred1, h1, c1 = decoder_forward(params, tokens[0], hidden, cell)
    jax.block_until_ready((pred1, h1, c1))
    rp1, rh1, rc1 = decoder_reference_step(params, tokens[0], hidden, cell)
    for got, ref in ((pred1, rp1), (h1, rh1), (c1, rc1)):
        err = float(jnp.max(jnp.abs(got - ref)))
        assert jnp.allclose(got, ref, rtol=RTOL, atol=ATOL), err

    print("KERNEL_OK")
</pallas_src>

<mosaic_0001>
module attributes {stable_mosaic.version = 11 : i64} {
  func.func @_decoder_seq_kernel(%arg0: i32, %arg1: memref<6x8xi32, #tpu.memory_space<smem>>, %arg2: memref<2x8x32xf32, #tpu.memory_space<vmem>>, %arg3: memref<2x8x32xf32, #tpu.memory_space<vmem>>, %arg4: memref<128x32xf32, #tpu.memory_space<vmem>>, %arg5: memref<32x128xbf16, #tpu.memory_space<vmem>>, %arg6: memref<32x128xbf16, #tpu.memory_space<vmem>>, %arg7: memref<1x128xf32, #tpu.memory_space<vmem>>, %arg8: memref<32x128xbf16, #tpu.memory_space<vmem>>, %arg9: memref<32x128xbf16, #tpu.memory_space<vmem>>, %arg10: memref<1x128xf32, #tpu.memory_space<vmem>>, %arg11: memref<32x128xbf16, #tpu.memory_space<vmem>>, %arg12: memref<1x128xf32, #tpu.memory_space<vmem>>, %arg13: memref<1x8x128xf32, #tpu.memory_space<vmem>>, %arg14: memref<8x128xf32, #tpu.memory_space<vmem>>, %arg15: memref<2x8x32xf32, #tpu.memory_space<vmem>>, %arg16: memref<2x8x32xf32, #tpu.memory_space<vmem>>, %arg17: memref<8x32xf32, #tpu.memory_space<vmem>>) attributes {dimension_semantics = [#tpu.dimension_semantics<arbitrary>], iteration_bounds = array<i64: 6>, scalar_prefetch = 0 : i64, scratch_operands = 3 : i64, tpu.core_type = #tpu.core_type<tc>, window_params = [{transform_indices = @transform_0, window_bounds = array<i64: 6, 8>}, {pipeline_mode = #tpu.pipeline_mode<synchronous>, transform_indices = @transform_1, window_bounds = array<i64: 2, 8, 32>}, {pipeline_mode = #tpu.pipeline_mode<synchronous>, transform_indices = @transform_2, window_bounds = array<i64: 2, 8, 32>}, {pipeline_mode = #tpu.pipeline_mode<synchronous>, transform_indices = @transform_3, window_bounds = array<i64: 128, 32>}, {pipeline_mode = #tpu.pipeline_mode<synchronous>, transform_indices = @transform_4, window_bounds = array<i64: 32, 128>}, {pipeline_mode = #tpu.pipeline_mode<synchronous>, transform_indices = @transform_5, window_bounds = array<i64: 32, 128>}, {pipeline_mode = #tpu.pipeline_mode<synchronous>, transform_indices = @transform_6, window_bounds = array<i64: 1, 128>}, {pipeline_mode = #tpu.pipeline_mode<synchronous>, transform_indices = @transform_7, window_bounds = array<i64: 32, 128>}, {pipeline_mode = #tpu.pipeline_mode<synchronous>, transform_indices = @transform_8, window_bounds = array<i64: 32, 128>}, {pipeline_mode = #tpu.pipeline_mode<synchronous>, transform_indices = @transform_9, window_bounds = array<i64: 1, 128>}, {pipeline_mode = #tpu.pipeline_mode<synchronous>, transform_indices = @transform_10, window_bounds = array<i64: 32, 128>}, {pipeline_mode = #tpu.pipeline_mode<synchronous>, transform_indices = @transform_11, window_bounds = array<i64: 1, 128>}, {transform_indices = @transform_12, window_bounds = array<i64: 1, 8, 128>}, {pipeline_mode = #tpu.pipeline_mode<synchronous>, transform_indices = @transform_13, window_bounds = array<i64: 8, 128>}]} {
    %c0_i32 = arith.constant 0 : i32
    %0 = arith.cmpi eq, %arg0, %c0_i32 : i32
    %1 = arith.extui %0 : i1 to i32
    %c0_i32_0 = arith.constant 0 : i32
    %2 = arith.cmpi ne, %1, %c0_i32_0 : i32
    scf.if %2 {
      %c0_92 = arith.constant 0 : index
      %c0_93 = arith.constant 0 : index
      %c0_94 = arith.constant 0 : index
      %142 = vector.load %arg2[%c0_92, %c0_93, %c0_94] : memref<2x8x32xf32, #tpu.memory_space<vmem>>, vector<2x8x32xf32>
      %c0_95 = arith.constant 0 : index
      %c0_96 = arith.constant 0 : index
      %c0_97 = arith.constant 0 : index
      %143 = vector.load %arg15[%c0_95, %c0_96, %c0_97] : memref<2x8x32xf32, #tpu.memory_space<vmem>>, vector<2x8x32xf32>
      tpu.vector_store %arg15[%c0_95, %c0_96, %c0_97], %142 {strides = array<i32>} : memref<2x8x32xf32, #tpu.memory_space<vmem>>, vector<2x8x32xf32>,
      %c0_98 = arith.constant 0 : index
      %c0_99 = arith.constant 0 : index
      %c0_100 = arith.constant 0 : index
      %144 = vector.load %arg3[%c0_98, %c0_99, %c0_100] : memref<2x8x32xf32, #tpu.memory_space<vmem>>, vector<2x8x32xf32>
      %c0_101 = arith.constant 0 : index
      %c0_102 = arith.constant 0 : index
      %c0_103 = arith.constant 0 : index
      %145 = vector.load %arg16[%c0_101, %c0_102, %c0_103] : memref<2x8x32xf32, #tpu.memory_space<vmem>>, vector<2x8x32xf32>
      tpu.vector_store %arg16[%c0_101, %c0_102, %c0_103], %144 {strides = array<i32>} : memref<2x8x32xf32, #tpu.memory_space<vmem>>, vector<2x8x32xf32>,
    } else {
    }
    %3 = arith.index_cast %arg0 : i32 to index
    %c0 = arith.constant 0 : index
    %4 = memref.load %arg1[%3, %c0] : memref<6x8xi32, #tpu.memory_space<smem>>
    %c0_i32_1 = arith.constant 0 : i32
    %5 = arith.maxsi %4, %c0_i32_1 : i32
    %c127_i32 = arith.constant 127 : i32
    %6 = arith.minsi %5, %c127_i32 : i32
    %7 = arith.index_cast %6 : i32 to index
    %c0_2 = arith.constant 0 : index
    %8 = vector.load %arg4[%7, %c0_2] : memref<128x32xf32, #tpu.memory_space<vmem>>, vector<1x32xf32>
    %c0_3 = arith.constant 0 : index
    %c0_4 = arith.constant 0 : index
    %9 = vector.load %arg17[%c0_3, %c0_4] : memref<8x32xf32, #tpu.memory_space<vmem>>, vector<1x32xf32>
    tpu.vector_store %arg17[%c0_3, %c0_4], %8 {strides = array<i32>} : memref<8x32xf32, #tpu.memory_space<vmem>>, vector<1x32xf32>,
    %10 = arith.index_cast %arg0 : i32 to index
    %c1 = arith.constant 1 : index
    %11 = memref.load %arg1[%10, %c1] : memref<6x8xi32, #tpu.memory_space<smem>>
    %c0_i32_5 = arith.constant 0 : i32
    %12 = arith.maxsi %11, %c0_i32_5 : i32
    %c127_i32_6 = arith.constant 127 : i32
    %13 = arith.minsi %12, %c127_i32_6 : i32
    %14 = arith.index_cast %13 : i32 to index
    %c0_7 = arith.constant 0 : index
    %15 = vector.load %arg4[%14, %c0_7] : memref<128x32xf32, #tpu.memory_space<vmem>>, vector<1x32xf32>
    %c1_8 = arith.constant 1 : index
    %c0_9 = arith.constant 0 : index
    %16 = vector.load %arg17[%c1_8, %c0_9] : memref<8x32xf32, #tpu.memory_space<vmem>>, vector<1x32xf32>
    tpu.vector_store %arg17[%c1_8, %c0_9], %15 {strides = array<i32>} : memref<8x32xf32, #tpu.memory_space<vmem>>, vector<1x32xf32>,
    %17 = arith.index_cast %arg0 : i32 to index
    %c2 = arith.constant 2 : index
    %18 = memref.load %arg1[%17, %c2] : memref<6x8xi32, #tpu.memory_space<smem>>
    %c0_i32_10 = arith.constant 0 : i32
    %19 = arith.maxsi %18, %c0_i32_10 : i32
    %c127_i32_11 = arith.constant 127 : i32
    %20 = arith.minsi %19, %c127_i32_11 : i32
    %21 = arith.index_cast %20 : i32 to index
    %c0_12 = arith.constant 0 : index
    %22 = vector.load %arg4[%21, %c0_12] : memref<128x32xf32, #tpu.memory_space<vmem>>, vector<1x32xf32>
    %c2_13 = arith.constant 2 : index
    %c0_14 = arith.constant 0 : index
    %23 = vector.load %arg17[%c2_13, %c0_14] : memref<8x32xf32, #tpu.memory_space<vmem>>, vector<1x32xf32>
    tpu.vector_store %arg17[%c2_13, %c0_14], %22 {strides = array<i32>} : memref<8x32xf32, #tpu.memory_space<vmem>>, vector<1x32xf32>,
    %24 = arith.index_cast %arg0 : i32 to index
    %c3 = arith.constant 3 : index
    %25 = memref.load %arg1[%24, %c3] : memref<6x8xi32, #tpu.memory_space<smem>>
    %c0_i32_15 = arith.constant 0 : i32
    %26 = arith.maxsi %25, %c0_i32_15 : i32
    %c127_i32_16 = arith.constant 127 : i32
    %27 = arith.minsi %26, %c127_i32_16 : i32
    %28 = arith.index_cast %27 : i32 to index
    %c0_17 = arith.constant 0 : index
    %29 = vector.load %arg4[%28, %c0_17] : memref<128x32xf32, #tpu.memory_space<vmem>>, vector<1x32xf32>
    %c3_18 = arith.constant 3 : index
    %c0_19 = arith.constant 0 : index
    %30 = vector.load %arg17[%c3_18, %c0_19] : memref<8x32xf32, #tpu.memory_space<vmem>>, vector<1x32xf32>
    tpu.vector_store %arg17[%c3_18, %c0_19], %29 {strides = array<i32>} : memref<8x32xf32, #tpu.memory_space<vmem>>, vector<1x32xf32>,
    %31 = arith.index_cast %arg0 : i32 to index
    %c4 = arith.constant 4 : index
    %32 = memref.load %arg1[%31, %c4] : memref<6x8xi32, #tpu.memory_space<smem>>
    %c0_i32_20 = arith.constant 0 : i32
    %33 = arith.maxsi %32, %c0_i32_20 : i32
    %c127_i32_21 = arith.constant 127 : i32
    %34 = arith.minsi %33, %c127_i32_21 : i32
    %35 = arith.index_cast %34 : i32 to index
    %c0_22 = arith.constant 0 : index
    %36 = vector.load %arg4[%35, %c0_22] : memref<128x32xf32, #tpu.memory_space<vmem>>, vector<1x32xf32>
    %c4_23 = arith.constant 4 : index
    %c0_24 = arith.constant 0 : index
    %37 = vector.load %arg17[%c4_23, %c0_24] : memref<8x32xf32, #tpu.memory_space<vmem>>, vector<1x32xf32>
    tpu.vector_store %arg17[%c4_23, %c0_24], %36 {strides = array<i32>} : memref<8x32xf32, #tpu.memory_space<vmem>>, vector<1x32xf32>,
    %38 = arith.index_cast %arg0 : i32 to index
    %c5 = arith.constant 5 : index
    %39 = memref.load %arg1[%38, %c5] : memref<6x8xi32, #tpu.memory_space<smem>>
    %c0_i32_25 = arith.constant 0 : i32
    %40 = arith.maxsi %39, %c0_i32_25 : i32
    %c127_i32_26 = arith.constant 127 : i32
    %41 = arith.minsi %40, %c127_i32_26 : i32
    %42 = arith.index_cast %41 : i32 to index
    %c0_27 = arith.constant 0 : index
    %43 = vector.load %arg4[%42, %c0_27] : memref<128x32xf32, #tpu.memory_space<vmem>>, vector<1x32xf32>
    %c5_28 = arith.constant 5 : index
    %c0_29 = arith.constant 0 : index
    %44 = vector.load %arg17[%c5_28, %c0_29] : memref<8x32xf32, #tpu.memory_space<vmem>>, vector<1x32xf32>
    tpu.vector_store %arg17[%c5_28, %c0_29], %43 {strides = array<i32>} : memref<8x32xf32, #tpu.memory_space<vmem>>, vector<1x32xf32>,
    %45 = arith.index_cast %arg0 : i32 to index
    %c6 = arith.constant 6 : index
    %46 = memref.load %arg1[%45, %c6] : memref<6x8xi32, #tpu.memory_space<smem>>
    %c0_i32_30 = arith.constant 0 : i32
    %47 = arith.maxsi %46, %c0_i32_30 : i32
    %c127_i32_31 = arith.constant 127 : i32
    %48 = arith.minsi %47, %c127_i32_31 : i32
    %49 = arith.index_cast %48 : i32 to index
    %c0_32 = arith.constant 0 : index
    %50 = vector.load %arg4[%49, %c0_32] : memref<128x32xf32, #tpu.memory_space<vmem>>, vector<1x32xf32>
    %c6_33 = arith.constant 6 : index
    %c0_34 = arith.constant 0 : index
    %51 = vector.load %arg17[%c6_33, %c0_34] : memref<8x32xf32, #tpu.memory_space<vmem>>, vector<1x32xf32>
    tpu.vector_store %arg17[%c6_33, %c0_34], %50 {strides = array<i32>} : memref<8x32xf32, #tpu.memory_space<vmem>>, vector<1x32xf32>,
    %52 = arith.index_cast %arg0 : i32 to index
    %c7 = arith.constant 7 : index
    %53 = memref.load %arg1[%52, %c7] : memref<6x8xi32, #tpu.memory_space<smem>>
    %c0_i32_35 = arith.constant 0 : i32
    %54 = arith.maxsi %53, %c0_i32_35 : i32
    %c127_i32_36 = arith.constant 127 : i32
    %55 = arith.minsi %54, %c127_i32_36 : i32
    %56 = arith.index_cast %55 : i32 to index
    %c0_37 = arith.constant 0 : index
    %57 = vector.load %arg4[%56, %c0_37] : memref<128x32xf32, #tpu.memory_space<vmem>>, vector<1x32xf32>
    %c7_38 = arith.constant 7 : index
    %c0_39 = arith.constant 0 : index
    %58 = vector.load %arg17[%c7_38, %c0_39] : memref<8x32xf32, #tpu.memory_space<vmem>>, vector<1x32xf32>
    tpu.vector_store %arg17[%c7_38, %c0_39], %57 {strides = array<i32>} : memref<8x32xf32, #tpu.memory_space<vmem>>, vector<1x32xf32>,
    %c0_40 = arith.constant 0 : index
    %c0_41 = arith.constant 0 : index
    %59 = vector.load %arg17[%c0_40, %c0_41] : memref<8x32xf32, #tpu.memory_space<vmem>>, vector<8x32xf32>
    %c0_42 = arith.constant 0 : index
    %c0_43 = arith.constant 0 : index
    %c0_44 = arith.constant 0 : index
    %60 = vector.load %arg15[%c0_42, %c0_43, %c0_44] : memref<2x8x32xf32, #tpu.memory_space<vmem>>, vector<1x8x32xf32>
    %61 = vector.shape_cast %60 : vector<1x8x32xf32> to vector<8x32xf32>
    %c0_45 = arith.constant 0 : index
    %c0_46 = arith.constant 0 : index
    %c0_47 = arith.constant 0 : index
    %62 = vector.load %arg16[%c0_45, %c0_46, %c0_47] : memref<2x8x32xf32, #tpu.memory_space<vmem>>, vector<1x8x32xf32>
    %63 = vector.shape_cast %62 : vector<1x8x32xf32> to vector<8x32xf32>
    %64 = arith.truncf %59 : vector<8x32xf32> to vector<8x32xbf16>
    %c0_48 = arith.constant 0 : index
    %c0_49 = arith.constant 0 : index
    %65 = vector.load %arg5[%c0_48, %c0_49] : memref<32x128xbf16, #tpu.memory_space<vmem>>, vector<32x128xbf16>
    %cst = arith.constant dense<0.000000e+00> : vector<8x128xf32>
    %66 = tpu.matmul %64, %65, %cst {dimension_numbers = #tpu.dot_dimension_numbers<[1], [0], [0], [1], [0, 0, 1, 1], [], []>} : vector<8x32xbf16>, vector<32x128xbf16>, vector<8x128xf32> -> vector<8x128xf32>
    %67 = arith.truncf %61 : vector<8x32xf32> to vector<8x32xbf16>
    %c0_50 = arith.constant 0 : index
    %c0_51 = arith.constant 0 : index
    %68 = vector.load %arg6[%c0_50, %c0_51] : memref<32x128xbf16, #tpu.memory_space<vmem>>, vector<32x128xbf16>
    %cst_52 = arith.constant dense<0.000000e+00> : vector<8x128xf32>
    %69 = tpu.matmul %67, %68, %cst_52 {dimension_numbers = #tpu.dot_dimension_numbers<[1], [0], [0], [1], [0, 0, 1, 1], [], []>} : vector<8x32xbf16>, vector<32x128xbf16>, vector<8x128xf32> -> vector<8x128xf32>
    %70 = arith.addf %66, %69 : vector<8x128xf32>
    %c0_53 = arith.constant 0 : index
    %c0_54 = arith.constant 0 : index
    %71 = vector.load %arg7[%c0_53, %c0_54] : memref<1x128xf32, #tpu.memory_space<vmem>>, vector<1x128xf32>
    %72 = vector.broadcast %71 : vector<1x128xf32> to vector<8x128xf32>
    %73 = arith.addf %70, %72 : vector<8x128xf32>
    %74 = arith.negf %73 : vector<8x128xf32>
    %75 = math.exp %74 : vector<8x128xf32>
    %cst_55 = arith.constant 1.000000e+00 : f32
    %76 = vector.broadcast %cst_55 : f32 to vector<8x128xf32>
    %77 = arith.addf %76, %75 : vector<8x128xf32>
    %78 = arith.divf %76, %77 : vector<8x128xf32>
    %79 = math.tanh %73 : vector<8x128xf32>
    %80 = vector.extract_strided_slice %78 {offsets = [0, 0], sizes = [8, 32], strides = [1, 1]} : vector<8x128xf32> to vector<8x32xf32>
    %81 = vector.extract_strided_slice %78 {offsets = [0, 32], sizes = [8, 32], strides = [1, 1]} : vector<8x128xf32> to vector<8x32xf32>
    %82 = vector.extract_strided_slice %79 {offsets = [0, 64], sizes = [8, 32], strides = [1, 1]} : vector<8x128xf32> to vector<8x32xf32>
    %83 = vector.extract_strided_slice %78 {offsets = [0, 96], sizes = [8, 32], strides = [1, 1]} : vector<8x128xf32> to vector<8x32xf32>
    %84 = arith.mulf %81, %63 : vector<8x32xf32>
    %85 = arith.mulf %80, %82 : vector<8x32xf32>
    %86 = arith.addf %84, %85 : vector<8x32xf32>
    %87 = math.tanh %86 : vector<8x32xf32>
    %88 = arith.mulf %83, %87 : vector<8x32xf32>
    %c0_56 = arith.constant 0 : index
    %c0_57 = arith.constant 0 : index
    %c0_58 = arith.constant 0 : index
    %89 = vector.load %arg15[%c0_56, %c0_57, %c0_58] : memref<2x8x32xf32, #tpu.memory_space<vmem>>, vector<1x8x32xf32>
    %90 = vector.shape_cast %89 : vector<1x8x32xf32> to vector<8x32xf32>
    %91 = vector.shape_cast %88 : vector<8x32xf32> to vector<1x8x32xf32>
    tpu.vector_store %arg15[%c0_56, %c0_57, %c0_58], %91 {strides = array<i32>} : memref<2x8x32xf32, #tpu.memory_space<vmem>>, vector<1x8x32xf32>,
    %c0_59 = arith.constant 0 : index
    %c0_60 = arith.constant 0 : index
    %c0_61 = arith.constant 0 : index
    %92 = vector.load %arg16[%c0_59, %c0_60, %c0_61] : memref<2x8x32xf32, #tpu.memory_space<vmem>>, vector<1x8x32xf32>
    %93 = vector.shape_cast %92 : vector<1x8x32xf32> to vector<8x32xf32>
    %94 = vector.shape_cast %86 : vector<8x32xf32> to vector<1x8x32xf32>
    tpu.vector_store %arg16[%c0_59, %c0_60, %c0_61], %94 {strides = array<i32>} : memref<2x8x32xf32, #tpu.memory_space<vmem>>, vector<1x8x32xf32>,
    %c1_62 = arith.constant 1 : index
    %c0_63 = arith.constant 0 : index
    %c0_64 = arith.constant 0 : index
    %95 = vector.load %arg15[%c1_62, %c0_63, %c0_64] : memref<2x8x32xf32, #tpu.memory_space<vmem>>, vector<1x8x32xf32>
    %96 = vector.shape_cast %95 : vector<1x8x32xf32> to vector<8x32xf32>
    %c1_65 = arith.constant 1 : index
    %c0_66 = arith.constant 0 : index
    %c0_67 = arith.constant 0 : index
    %97 = vector.load %arg16[%c1_65, %c0_66, %c0_67] : memref<2x8x32xf32, #tpu.memory_space<vmem>>, vector<1x8x32xf32>
    %98 = vector.shape_cast %97 : vector<1x8x32xf32> to vector<8x32xf32>
    %99 = arith.truncf %88 : vector<8x32xf32> to vector<8x32xbf16>
    %c0_68 = arith.constant 0 : index
    %c0_69 = arith.constant 0 : index
    %100 = vector.load %arg8[%c0_68, %c0_69] : memref<32x128xbf16, #tpu.memory_space<vmem>>, vector<32x128xbf16>
    %cst_70 = arith.constant dense<0.000000e+00> : vector<8x128xf32>
    %101 = tpu.matmul %99, %100, %cst_70 {dimension_numbers = #tpu.dot_dimension_numbers<[1], [0], [0], [1], [0, 0, 1, 1], [], []>} : vector<8x32xbf16>, vector<32x128xbf16>, vector<8x128xf32> -> vector<8x128xf32>
    %102 = arith.truncf %96 : vector<8x32xf32> to vector<8x32xbf16>
    %c0_71 = arith.constant 0 : index
    %c0_72 = arith.constant 0 : index
    %103 = vector.load %arg9[%c0_71, %c0_72] : memref<32x128xbf16, #tpu.memory_space<vmem>>, vector<32x128xbf16>
    %cst_73 = arith.constant dense<0.000000e+00> : vector<8x128xf32>
    %104 = tpu.matmul %102, %103, %cst_73 {dimension_numbers = #tpu.dot_dimension_numbers<[1], [0], [0], [1], [0, 0, 1, 1], [], []>} : vector<8x32xbf16>, vector<32x128xbf16>, vector<8x128xf32> -> vector<8x128xf32>
    %105 = arith.addf %101, %104 : vector<8x128xf32>
    %c0_74 = arith.constant 0 : index
    %c0_75 = arith.constant 0 : index
    %106 = vector.load %arg10[%c0_74, %c0_75] : memref<1x128xf32, #tpu.memory_space<vmem>>, vector<1x128xf32>
    %107 = vector.broadcast %106 : vector<1x128xf32> to vector<8x128xf32>
    %108 = arith.addf %105, %107 : vector<8x128xf32>
    %109 = arith.negf %108 : vector<8x128xf32>
    %110 = math.exp %109 : vector<8x128xf32>
    %cst_76 = arith.constant 1.000000e+00 : f32
    %111 = vector.broadcast %cst_76 : f32 to vector<8x128xf32>
    %112 = arith.addf %111, %110 : vector<8x128xf32>
    %113 = arith.divf %111, %112 : vector<8x128xf32>
    %114 = math.tanh %108 : vector<8x128xf32>
    %115 = vector.extract_strided_slice %113 {offsets = [0, 0], sizes = [8, 32], strides = [1, 1]} : vector<8x128xf32> to vector<8x32xf32>
    %116 = vector.extract_strided_slice %113 {offsets = [0, 32], sizes = [8, 32], strides = [1, 1]} : vector<8x128xf32> to vector<8x32xf32>
    %117 = vector.extract_strided_slice %114 {offsets = [0, 64], sizes = [8, 32], strides = [1, 1]} : vector<8x128xf32> to vector<8x32xf32>
    %118 = vector.extract_strided_slice %113 {offsets = [0, 96], sizes = [8, 32], strides = [1, 1]} : vector<8x128xf32> to vector<8x32xf32>
    %119 = arith.mulf %116, %98 : vector<8x32xf32>
    %120 = arith.mulf %115, %117 : vector<8x32xf32>
    %121 = arith.addf %119, %120 : vector<8x32xf32>
    %122 = math.tanh %121 : vector<8x32xf32>
    %123 = arith.mulf %118, %122 : vector<8x32xf32>
    %c1_77 = arith.constant 1 : index
    %c0_78 = arith.constant 0 : index
    %c0_79 = arith.constant 0 : index
    %124 = vector.load %arg15[%c1_77, %c0_78, %c0_79] : memref<2x8x32xf32, #tpu.memory_space<vmem>>, vector<1x8x32xf32>
    %125 = vector.shape_cast %124 : vector<1x8x32xf32> to vector<8x32xf32>
    %126 = vector.shape_cast %123 : vector<8x32xf32> to vector<1x8x32xf32>
    tpu.vector_store %arg15[%c1_77, %c0_78, %c0_79], %126 {strides = array<i32>} : memref<2x8x32xf32, #tpu.memory_space<vmem>>, vector<1x8x32xf32>,
    %c1_80 = arith.constant 1 : index
    %c0_81 = arith.constant 0 : index
    %c0_82 = arith.constant 0 : index
    %127 = vector.load %arg16[%c1_80, %c0_81, %c0_82] : memref<2x8x32xf32, #tpu.memory_space<vmem>>, vector<1x8x32xf32>
    %128 = vector.shape_cast %127 : vector<1x8x32xf32> to vector<8x32xf32>
    %129 = vector.shape_cast %121 : vector<8x32xf32> to vector<1x8x32xf32>
    tpu.vector_store %arg16[%c1_80, %c0_81, %c0_82], %129 {strides = array<i32>} : memref<2x8x32xf32, #tpu.memory_space<vmem>>, vector<1x8x32xf32>,
    %130 = arith.truncf %123 : vector<8x32xf32> to vector<8x32xbf16>
    %c0_83 = arith.constant 0 : index
    %c0_84 = arith.constant 0 : index
    %131 = vector.load %arg11[%c0_83, %c0_84] : memref<32x128xbf16, #tpu.memory_space<vmem>>, vector<32x128xbf16>
    %cst_85 = arith.constant dense<0.000000e+00> : vector<8x128xf32>
    %132 = tpu.matmul %130, %131, %cst_85 {dimension_numbers = #tpu.dot_dimension_numbers<[1], [0], [0], [1], [0, 0, 1, 1], [], []>} : vector<8x32xbf16>, vector<32x128xbf16>, vector<8x128xf32> -> vector<8x128xf32>
    %c0_86 = arith.constant 0 : index
    %c0_87 = arith.constant 0 : index
    %133 = vector.load %arg12[%c0_86, %c0_87] : memref<1x128xf32, #tpu.memory_space<vmem>>, vector<1x128xf32>
    %134 = vector.broadcast %133 : vector<1x128xf32> to vector<8x128xf32>
    %135 = arith.addf %132, %134 : vector<8x128xf32>
    %c0_88 = arith.constant 0 : index
    %c0_89 = arith.constant 0 : index
    %c0_90 = arith.constant 0 : index
    %136 = vector.load %arg13[%c0_88, %c0_89, %c0_90] : memref<1x8x128xf32, #tpu.memory_space<vmem>>, vector<1x8x128xf32>
    %137 = vector.shape_cast %136 : vector<1x8x128xf32> to vector<8x128xf32>
    %138 = vector.shape_cast %135 : vector<8x128xf32> to vector<1x8x128xf32>
    tpu.vector_store %arg13[%c0_88, %c0_89, %c0_90], %138 {strides = array<i32>} : memref<1x8x128xf32, #tpu.memory_space<vmem>>, vector<1x8x128xf32>,
    %c5_i32 = arith.constant 5 : i32
    %139 = arith.cmpi eq, %arg0, %c5_i32 : i32
    %140 = arith.extui %139 : i1 to i32
    %c0_i32_91 = arith.constant 0 : i32
    %141 = arith.cmpi ne, %140, %c0_i32_91 : i32
    scf.if %141 {
      %c0_92 = arith.constant 0 : index
      %c0_93 = arith.constant 0 : index
      %c0_94 = arith.constant 0 : index
      %142 = vector.load %arg15[%c0_92, %c0_93, %c0_94] : memref<2x8x32xf32, #tpu.memory_space<vmem>>, vector<1x8x32xf32>
      %143 = vector.shape_cast %142 : vector<1x8x32xf32> to vector<8x32xf32>
      %c0_95 = arith.constant 0 : index
      %c0_96 = arith.constant 0 : index
      %144 = vector.load %arg14[%c0_95, %c0_96] : memref<8x128xf32, #tpu.memory_space<vmem>>, vector<8x32xf32>
      tpu.vector_store %arg14[%c0_95, %c0_96], %143 {strides = array<i32>} : memref<8x128xf32, #tpu.memory_space<vmem>>, vector<8x32xf32>,
      %c0_97 = arith.constant 0 : index
      %c0_98 = arith.constant 0 : index
      %c0_99 = arith.constant 0 : index
      %145 = vector.load %arg16[%c0_97, %c0_98, %c0_99] : memref<2x8x32xf32, #tpu.memory_space<vmem>>, vector<1x8x32xf32>
      %146 = vector.shape_cast %145 : vector<1x8x32xf32> to vector<8x32xf32>
      %c0_100 = arith.constant 0 : index
      %c64 = arith.constant 64 : index
      %147 = vector.load %arg14[%c0_100, %c64] : memref<8x128xf32, #tpu.memory_space<vmem>>, vector<8x32xf32>
      tpu.vector_store %arg14[%c0_100, %c64], %146 {strides = array<i32>} : memref<8x128xf32, #tpu.memory_space<vmem>>, vector<8x32xf32>,
      %c1_101 = arith.constant 1 : index
      %c0_102 = arith.constant 0 : index
      %c0_103 = arith.constant 0 : index
      %148 = vector.load %arg15[%c1_101, %c0_102, %c0_103] : memref<2x8x32xf32, #tpu.memory_space<vmem>>, vector<1x8x32xf32>
      %149 = vector.shape_cast %148 : vector<1x8x32xf32> to vector<8x32xf32>
      %c0_104 = arith.constant 0 : index
      %c32 = arith.constant 32 : index
      %150 = vector.load %arg14[%c0_104, %c32] : memref<8x128xf32, #tpu.memory_space<vmem>>, vector<8x32xf32>
      tpu.vector_store %arg14[%c0_104, %c32], %149 {strides = array<i32>} : memref<8x128xf32, #tpu.memory_space<vmem>>, vector<8x32xf32>,
      %c1_105 = arith.constant 1 : index
      %c0_106 = arith.constant 0 : index
      %c0_107 = arith.constant 0 : index
      %151 = vector.load %arg16[%c1_105, %c0_106, %c0_107] : memref<2x8x32xf32, #tpu.memory_space<vmem>>, vector<1x8x32xf32>
      %152 = vector.shape_cast %151 : vector<1x8x32xf32> to vector<8x32xf32>
      %c0_108 = arith.constant 0 : index
      %c96 = arith.constant 96 : index
      %153 = vector.load %arg14[%c0_108, %c96] : memref<8x128xf32, #tpu.memory_space<vmem>>, vector<8x32xf32>
      tpu.vector_store %arg14[%c0_108, %c96], %152 {strides = array<i32>} : memref<8x128xf32, #tpu.memory_space<vmem>>, vector<8x32xf32>,
    } else {
    }
    return
  }
  func.func @transform_0(%arg0: i32) -> (i32, i32) {
    %c0_i32 = arith.constant 0 : i32
    %c0_i32_0 = arith.constant 0 : i32
    %c0_i32_1 = arith.constant 0 : i32
    return %c0_i32, %c0_i32_0 : i32, i32
  }
  func.func @transform_1(%arg0: i32) -> (i32, i32, i32) {
    %c0_i32 = arith.constant 0 : i32
    %c0_i32_0 = arith.constant 0 : i32
    %c0_i32_1 = arith.constant 0 : i32
    %c0_i32_2 = arith.constant 0 : i32
    return %c0_i32, %c0_i32_0, %c0_i32_1 : i32, i32, i32
  }
  func.func @transform_2(%arg0: i32) -> (i32, i32, i32) {
    %c0_i32 = arith.constant 0 : i32
    %c0_i32_0 = arith.constant 0 : i32
    %c0_i32_1 = arith.constant 0 : i32
    %c0_i32_2 = arith.constant 0 : i32
    return %c0_i32, %c0_i32_0, %c0_i32_1 : i32, i32, i32
  }
  func.func @transform_3(%arg0: i32) -> (i32, i32) {
    %c0_i32 = arith.constant 0 : i32
    %c0_i32_0 = arith.constant 0 : i32
    %c0_i32_1 = arith.constant 0 : i32
    return %c0_i32, %c0_i32_0 : i32, i32
  }
  func.func @transform_4(%arg0: i32) -> (i32, i32) {
    %c0_i32 = arith.constant 0 : i32
    %c0_i32_0 = arith.constant 0 : i32
    %c0_i32_1 = arith.constant 0 : i32
    return %c0_i32, %c0_i32_0 : i32, i32
  }
  func.func @transform_5(%arg0: i32) -> (i32, i32) {
    %c0_i32 = arith.constant 0 : i32
    %c0_i32_0 = arith.constant 0 : i32
    %c0_i32_1 = arith.constant 0 : i32
    return %c0_i32, %c0_i32_0 : i32, i32
  }
  func.func @transform_6(%arg0: i32) -> (i32, i32) {
    %c0_i32 = arith.constant 0 : i32
    %c0_i32_0 = arith.constant 0 : i32
    %c0_i32_1 = arith.constant 0 : i32
    return %c0_i32, %c0_i32_0 : i32, i32
  }
  func.func @transform_7(%arg0: i32) -> (i32, i32) {
    %c0_i32 = arith.constant 0 : i32
    %c0_i32_0 = arith.constant 0 : i32
    %c0_i32_1 = arith.constant 0 : i32
    return %c0_i32, %c0_i32_0 : i32, i32
  }
  func.func @transform_8(%arg0: i32) -> (i32, i32) {
    %c0_i32 = arith.constant 0 : i32
    %c0_i32_0 = arith.constant 0 : i32
    %c0_i32_1 = arith.constant 0 : i32
    return %c0_i32, %c0_i32_0 : i32, i32
  }
  func.func @transform_9(%arg0: i32) -> (i32, i32) {
    %c0_i32 = arith.constant 0 : i32
    %c0_i32_0 = arith.constant 0 : i32
    %c0_i32_1 = arith.constant 0 : i32
    return %c0_i32, %c0_i32_0 : i32, i32
  }
  func.func @transform_10(%arg0: i32) -> (i32, i32) {
    %c0_i32 = arith.constant 0 : i32
    %c0_i32_0 = arith.constant 0 : i32
    %c0_i32_1 = arith.constant 0 : i32
    return %c0_i32, %c0_i32_0 : i32, i32
  }
  func.func @transform_11(%arg0: i32) -> (i32, i32) {
    %c0_i32 = arith.constant 0 : i32
    %c0_i32_0 = arith.constant 0 : i32
    %c0_i32_1 = arith.constant 0 : i32
    return %c0_i32, %c0_i32_0 : i32, i32
  }
  func.func @transform_12(%arg0: i32) -> (i32, i32, i32) {
    %c0_i32 = arith.constant 0 : i32
    %c0_i32_0 = arith.constant 0 : i32
    %c0_i32_1 = arith.constant 0 : i32
    return %arg0, %c0_i32, %c0_i32_0 : i32, i32, i32
  }
  func.func @transform_13(%arg0: i32) -> (i32, i32) {
    %c0_i32 = arith.constant 0 : i32
    %c0_i32_0 = arith.constant 0 : i32
    %c0_i32_1 = arith.constant 0 : i32
    return %c0_i32, %c0_i32_0 : i32, i32
  }
}

</mosaic_0001>

<bundles_post_ra>
// kernel: decoder_forward_seq.1
= control target key start
LH: loop header
LB: loop body
LE: loop exit
PB: predicated region body
PF: predicated region fallthrough
CT: control target
= control target key end

     0   :  { %s1733_s0 = inlined_call_operand.vmem [shape: s32[6,8], index: 0, kind: input, shape index: {}]   ;;  %s1734_s1 = inlined_call_operand.vmem [shape: f32[2,8,32], index: 1, kind: input, shape index: {}]   ;;  %s1735_s2 = inlined_call_operand.vmem [shape: f32[2,8,32], index: 2, kind: input, shape index: {}]   ;;  %s1736_s3 = inlined_call_operand.vmem [shape: f32[128,32], index: 3, kind: input, shape index: {}]   ;;  %s1737_s4 = inlined_call_operand.vmem [shape: bf16[32,128], index: 4, kind: input, shape index: {}]   ;;  %s1738_s5 = inlined_call_operand.vmem [shape: bf16[32,128], index: 5, kind: input, shape index: {}]   ;;  %s1739_s6 = inlined_call_operand.vmem [shape: f32[1,128], index: 6, kind: input, shape index: {}]   ;;  %s1740_s7 = inlined_call_operand.vmem [shape: bf16[32,128], index: 7, kind: input, shape index: {}]   ;;  %s1741_s8 = inlined_call_operand.vmem [shape: bf16[32,128], index: 8, kind: input, shape index: {}]   ;;  %s1742_s9 = inlined_call_operand.vmem [shape: f32[1,128], index: 9, kind: input, shape index: {}]   ;;  %s1743_s10 = inlined_call_operand.vmem [shape: bf16[32,128], index: 10, kind: input, shape index: {}]   ;;  %s1744_s11 = inlined_call_operand.vmem [shape: f32[1,128], index: 11, kind: input, shape index: {}]   ;;  %s1745_s12 = inlined_call_operand.hbm [shape: f32[6,8,128], index: 12, kind: output, shape index: {0}]   ;;  %s1746_s13 = inlined_call_operand.vmem [shape: f32[8,128], index: 13, kind: output, shape index: {1}]  }
   0x1   :  { %1748 = sst [smem:[#allocation12_spill]] %s1733_s0 }
   0x2   :  { %1749 = sst [smem:[#allocation13_spill]] %s1734_s1 }
   0x3   :  { %1750 = sst [smem:[#allocation14_spill]] %s1735_s2 }
   0x4   :  { %1751 = sst [smem:[#allocation15_spill]] %s1737_s4 }
   0x5   :  { %1752 = sst [smem:[#allocation16_spill]] %s1738_s5 }
   0x6   :  { %19 = vsyncpa [#allocation7], 0 }
   0x7   :  { %20 = vsyncpa [#allocation6], 0 }
   0x8   :  { %22 = vsyncpa [#allocation6 + $0x1], 0  ;;  %s1437_s25 = smov 0   ;;  %s1439_s26 = smov 0  }
   0x9   :  { %s1441_s27 = smov 0   ;;  %s1443_s28 = smov 0  }
   0xa LB: > { %s1458_s29 = sadd.s32 4294967295, %s1355_s28   ;;  %s1046_s30 = sadd.s32 4294967294, %s1355_s28   ;;  %s1355_s28 = sphi %s1443_s28, %s1771_s28   ;;  %s1351_s27 = sphi %s1441_s27, %s1770_s27   ;;  %s1347_s26 = sphi %s1439_s26, %s1769_s26   ;;  %s1343_s25 = sphi %s1437_s25, %s1768_s25  }
   0xb   : > { %s1462_s14 = sadd.s32 1, %s1355_s28   ;;  %s287_s15 = sadd.s32 1, %s1351_s27 }
   0xc   : > { %s284_s16 = ssub.s32 %s1355_s28, %s1462_s14  ;;  %p297_p0 = scmp.ne.s32.totalorder %s1351_s27, %s1347_s26 }
   0xd   : > { %p285_p1 = scmp.eq.s32.totalorder %s284_s16, 0  ;;  %p298_p2 = scmp.eq.s32.totalorder %s1458_s29, 5 }
   0xe   : > { %p303_p3 = scmp.ne.s32.totalorder %s1347_s26, %s1343_s25  ;;  %p304_p4 = scmp.eq.s32.totalorder %s1046_s30, 5 }
   0xf   : > { %s1473_s17 = scalar_select %p285_p1, %s1351_s27, %s287_s15  }
  0x10   : > { %p1475_p5 = por %p298_p2, %p297_p0  ;;  %p1479_p6 = por %p304_p4, %p303_p3 }
  0x11   : > { %1753 = sst [smem:[#allocation11_spill]] %s1473_s17  ;;  %p1047_p7 = scmp.ge.s32.totalorder %s1355_s28, 1 }
  0x12   : > { %p332_p8 = scmp.lt.s32.totalorder %s1355_s28, 7  ;;  %p1204_p10 = scmp.eq.s32.totalorder %s1458_s29, 0 }
  0x13   : > { %s1757_s0 = sld [smem:[#allocation12_spill]] }
  0x14   : > { %p1487_p11 = pnand %p1047_p7, %p332_p8 }
  0x16   : > { %p1196_p12 = pneg %p1487_p11 }
  0x18   : > { %p1197_p13 = pnand %p1204_p10, %p1196_p12 }
  0x19   : > { %s345_s23 = sshll.u32 %s1757_s0, 4  ;;  %s346_s23 = int_to_ptr.vmem [resolvable:$true] %s345_s23 }
  0x1a   : > { %s1274_s24 = scalar_lea.vmem %s346_s23, 128  ;;  %p1276_p1 = pneg %p1197_p13 }
  0x1b   : > { %p1275_p0 = scmp.ne.s32.totalorder %s346_s23, %s1274_s24  ;;  %p1282_p4 = scmp.lt.s32.totalorder %s346_s23, %s346_s23 }
  0x1c   : > { %p1283_p7 = scmp.lt.s32.totalorder %s1274_s24, %s1274_s24 }
  0x1d   : > { %p1277_p2 = pnand %p1276_p1, %p1275_p0 }
  0x1e   : > { %p1284_p8 = por %p1283_p7, %p1282_p4 }
  0x1f   : > { %p1278_p3 = pneg %p1277_p2 }
  0x21   : > { %p1285_p9 = pnand %p1284_p8, %p1278_p3 }
  0x23   : > { %1288 = shalt.err (!%p1285_p9)
}
  0x24   : > { %s1357_s30 = smov [#allocation5]   ;;  %391 = sbr.rel (%p1487_p11) target bundleno = 1754 (0x6da), region = 68 }
  0x25   : > { %1199 = dma.vmem_to_smem (!%p1197_p13), %s346_s23, 128, %s1357_s30, [#allocation7]  }
  0x2b   : > { %1334 = dma.done.wait (%p1204_p10), [#allocation7], 128  }
  0x2c   : > { %1336 = vsyncadd (%p1204_p10), [#allocation7], 4294967168 }
  0x2d   : > { %397 = sfence }
  0x2e   : > { %s1747_s15 = sand.u32 1, %s1347_s26   ;;  %p1758_p9 = scmp.ne.s32.totalorder %s1458_s29, 0 }
  0x2f   : > { %s1507_s16 = sshll.u32 %s1747_s15, 3  ;;  %s1759_s1 = sld [smem:[#allocation13_spill]] (!%p1758_p9)  ;;  %vm438_vm0 = vcmask (!%p1758_p9), 261120  }
  0x30   : > { %435 = sbr.rel (%p1758_p9) target bundleno = 56 (0x38), region = 76  ;;  %s1760_s2 = sld [smem:[#allocation14_spill]] (!%p1758_p9) }
  0x35   : > { %v436_v0 = vld [vmem:[%s1759_s1] sm:$0xff] (!%p1758_p9)  ;;  %v437_v1 = vld [vmem:[%s1759_s1 + $0x8] sm:$0xff] (!%p1758_p9) }
  0x36   : > { %v441_v2 = vld [vmem:[%s1760_s2] sm:$0xff] (!%p1758_p9)  ;;  %439 = vst.msk [vmem:[#allocation2] sm:$0xff] (!%p1758_p9), %vm438_vm0, %v436_v0  ;;  %440 = vst.msk [vmem:[#allocation2 + $0x8] sm:$0xff] (!%p1758_p9), %vm438_vm0, %v437_v1  ;;  %v442_v3 = vld [vmem:[%s1760_s2 + $0x8] sm:$0xff] (!%p1758_p9) }
  0x37   : > { %443 = vst.msk [vmem:[#allocation3] sm:$0xff] %vm438_vm0, %v441_v2  ;;  %444 = vst.msk [vmem:[#allocation3 + $0x8] sm:$0xff] %vm438_vm0, %v442_v3 }
  0x38 PF: > { %s1761_s5 = sld [smem:[#allocation16_spill]]  ;;  %v1358_v5 = vmov 0.0   ;;  %s1762_s4 = sld [smem:[#allocation15_spill]]  ;;  %vm1359_vm1 = vmmov 0   ;;  %vm543_vm2 = vcmask 261120   ;;  %vm453_vm3 = vcmask 253952  }
  0x39   : > { %1150 = vmatprep.subr.bf16.mxu0 %v1358_v5  ;;  %1158 = vmatprep.subr.bf16.mxu1 %v1358_v5  ;;  %s1539_s21 = sshll.u32 %s1458_s29, 7  ;;  %v1100_v26 = vld [vmem:[%s1739_s6] ss:$0 sm:$0xff]  ;;  %v1254_v46 = vld [vmem:[%s1741_s8 + $0x8] sm:$0xff]  }
  0x3a   : > { %1154 = vmatprep.mubr.msk.bf16.mxu0 %vm1359_vm1, %v1358_v5  ;;  %1162 = vmatprep.mubr.msk.bf16.mxu1 %vm1359_vm1, %v1358_v5  ;;  %s446_s22 = sld [smem:[#allocation5 + %s1539_s21]]  ;;  %s455_s0 = sadd.s32 1, %s1539_s21  ;;  %v1252_v44 = vld [vmem:[%s1741_s8] sm:$0xff]   ;;  %v1255_v47 = vld [vmem:[%s1740_s7 + $0x8] sm:$0xff]  }
  0x3b   : > { %s456_s23 = sld [smem:[#allocation5 + %s455_s0]]  ;;  %s464_s24 = sadd.s32 2, %s1539_s21  ;;  %v1253_v45 = vld [vmem:[%s1740_s7] sm:$0xff]  }
  0x3c   : > { %s1550_s15 = sld [smem:[#allocation5 + %s464_s24]]  ;;  %s473_s1 = sadd.s32 3, %s1539_s21  ;;  %v1108_v61 = vld [vmem:[%s1742_s9] ss:$0 sm:$0xff] }
  0x3d   : > { %s1553_s2 = sld [smem:[#allocation5 + %s473_s1]]  ;;  %s491_s20 = sadd.s32 5, %s1539_s21 }
  0x3e   : > { %v1248_v4 = vld [vmem:[%s1761_s5] sm:$0xff]   ;;  %v1250_v7 = vld [vmem:[%s1761_s5 + $0x8] sm:$0xff]   ;;  %s482_s5 = sadd.s32 4, %s1539_s21  ;;  %s1562_s0 = sld [smem:[#allocation5 + %s491_s20]]  ;;  %v520_v33 = vld [vmem:[#allocation3] sm:$0xff] }
  0x3f   : > { %v1249_v6 = vld [vmem:[%s1762_s4] sm:$0xff]   ;;  %1151 = vmatpush3.bf16.msra.mxu0 %v1248_v4  ;;  %v1251_v9 = vld [vmem:[%s1762_s4 + $0x8] sm:$0xff]   ;;  %s1557_s30 = sld [smem:[#allocation5 + %s482_s5]]  ;;  %s1763_s1 = sadd.s32 6, %s1539_s21  ;;  %v691_v54 = vld [vmem:[#allocation3 + $0x8] sm:$0xff] }
  0x40   : > { %1152 = vmatprep.subr.bf16.mxu0 %v1358_v5  ;;  %1159 = vmatpush3.bf16.msra.mxu1 %v1249_v6  ;;  %v519_v8 = vld [vmem:[#allocation2] sm:$0xff]  ;;  %p447_p10 = scmp.gt.s32.totalorder %s446_s22, 0  ;;  %p1054_p11 = scmp.lt.s32.totalorder %s446_s22, 127  ;;  %v689_v48 = vld [vmem:[#allocation2 + $0x8] sm:$0xff] }
  0x41   : > { %1160 = vmatprep.subr.bf16.mxu1 %v1358_v5  ;;  %v526_v10 = vpack.c.bf16 %v519_v8, %v519_v8  ;;  %p457_p12 = scmp.gt.s32.totalorder %s456_s23, 0  ;;  %p1059_p13 = scmp.lt.s32.totalorder %s456_s23, 127  ;;  %v697_v49 = vpack.c.bf16 %v689_v48, %v689_v48 }
  0x42   : > { %s1773_s22 = smov (!%p447_p10, %s446_s22), 0  ;;  %p466_p0 = scmp.gt.s32.totalorder %s1550_s15, 0 }
  0x43   : > { %1153 = vmatpush3.bf16.msra.mxu0 %v1250_v7  ;;  %s1775_s23 = smov (!%p457_p12, %s456_s23), 0  ;;  %s1777_s22 = smov (!%p1054_p11, %s1773_s22), 127 }
  0x44   : > { %1161 = vmatpush3.bf16.msra.mxu1 %v1251_v9  ;;  %1166 = vmatprep.subr.bf16.mxu0 %v1358_v5  ;;  %s1779_s23 = smov (!%p1059_p13, %s1775_s23), 127  ;;  %s451_s20 = scalar_lea.vmem %s1736_s3, %s1777_s22 }
  0x45   : > { %1174 = vmatprep.subr.bf16.mxu1 %v1358_v5  ;;  %v452_v11 = vld [vmem:[%s451_s20] sm:$0x1]  ;;  %s461_s17 = scalar_lea.vmem %s1736_s3, %s1779_s23  ;;  %p1064_p1 = scmp.lt.s32.totalorder %s1550_s15, 127 }
  0x46   : > { %1155 = vmatmul.mubr.msk.bf16.vlgmr.msra.gmra.mrb[0].mxu0 %vm543_vm2, %v526_v10  ;;  %454 = vst.msk [vmem:[#allocation4] sm:$0x1] %vm453_vm3, %v452_v11  ;;  %v462_v12 = vld [vmem:[%s461_s17] sm:$0x1]  ;;  %s1781_s15 = smov (!%p466_p0, %s1550_s15), 0  ;;  %p475_p2 = scmp.gt.s32.totalorder %s1553_s2, 0 }
  0x47   : > { %1170 = vmatprep.mubr.msk.bf16.mxu0 %vm1359_vm1, %v1358_v5  ;;  %463 = vst.msk [vmem:[#allocation4 + $0x1] sm:$0x1] %vm453_vm3, %v462_v12  ;;  %p1069_p3 = scmp.lt.s32.totalorder %s1553_s2, 127  ;;  %s1783_s15 = smov (!%p1064_p1, %s1781_s15), 127  ;;  %1167 = vmatpush3.bf16.msra.mxu0 %v1252_v44 }
  0x48   : > { %s1785_s2 = smov (!%p475_p2, %s1553_s2), 0  ;;  %s470_s4 = scalar_lea.vmem %s1736_s3, %s1783_s15  ;;  %1168 = vmatprep.subr.bf16.mxu0 %v1358_v5 }
  0x49   : > { %p484_p4 = scmp.gt.s32.totalorder %s1557_s30, 0  ;;  %v471_v13 = vld [vmem:[%s470_s4] sm:$0x1]  ;;  %s1787_s2 = smov (!%p1069_p3, %s1785_s2), 127 }
  0x4a   : > { %472 = vst.msk [vmem:[#allocation4 + $0x2] sm:$0x1] %vm453_vm3, %v471_v13  ;;  %s479_s5 = scalar_lea.vmem %s1736_s3, %s1787_s2  ;;  %p1074_p7 = scmp.lt.s32.totalorder %s1557_s30, 127 }
  0x4b   : > { %s485_s17 = scalar_select %p484_p4, %s1557_s30, 0  ;;  %v480_v14 = vld [vmem:[%s479_s5] sm:$0x1]  ;;  %1169 = vmatpush3.bf16.msra.mxu0 %v1254_v46 }
  0x4c   : > { %p493_p8 = scmp.gt.s32.totalorder %s1562_s0, 0  ;;  %p1079_p9 = scmp.lt.s32.totalorder %s1562_s0, 127  ;;  %481 = vst.msk [vmem:[#allocation4 + $0x3] sm:$0x1] %vm453_vm3, %v480_v14  ;;  %1182 = vmatprep.subr.bf16.mxu0 %v1358_v5 }
  0x4d   : > { %s1789_s17 = smov (!%p1074_p7, %s485_s17), 127  ;;  %s501_s4 = sld [smem:[#allocation5 + %s1763_s1]] }
  0x4e   : > { %s1791_s0 = smov (!%p493_p8, %s1562_s0), 0  ;;  %s488_s22 = scalar_lea.vmem %s1736_s3, %s1789_s17  ;;  %1171 = vmatmul.mubr.msk.bf16.vlgmr.msra.gmra.mrb[4].mxu0 %vm543_vm2, %v697_v49 }
  0x4f   : > { %v489_v15 = vld [vmem:[%s488_s22] sm:$0x1]  ;;  %s1793_s0 = smov (!%p1079_p9, %s1791_s0), 127  ;;  %s509_s23 = sadd.s32 7, %s1539_s21  ;;  %1186 = vmatprep.mubr.msk.bf16.mxu0 %vm1359_vm1, %v1358_v5 }
  0x50   : > { %490 = vst.msk [vmem:[#allocation4 + $0x4] sm:$0x1] %vm453_vm3, %v489_v15  ;;  %s497_s24 = scalar_lea.vmem %s1736_s3, %s1793_s0  ;;  %s510_s5 = sld [smem:[#allocation5 + %s509_s23]] }
  0x51   : > { %v498_v16 = vld [vmem:[%s497_s24] sm:$0x1]  ;;  %s1360_s2 = smov 64   ;;  %s1361_s30 = smov 32  }
  0x52   : > { %499 = vst.msk [vmem:[#allocation4 + $0x5] sm:$0x1] %vm453_vm3, %v498_v16  ;;  %v1256_v16 = vld [vmem:[%s1743_s10] sm:$0xff]   ;;  %p1114_p0 = scmp.ne.s32.totalorder %s1458_s29, 5 }
  0x53   : > { %p502_p10 = scmp.gt.s32.totalorder %s501_s4, 0  ;;  %p1084_p11 = scmp.lt.s32.totalorder %s501_s4, 127  ;;  %1183 = vmatpush3.bf16.msra.mxu0 %v1256_v16  ;;  %vm943_vm4 = vcmask (!%p1114_p0), 785920   ;;  %vm950_vm5 = vcmask (!%p1114_p0), 523520   ;;  %vm957_vm6 = vcmask (!%p1114_p0), 1048320  }
  0x54   : > { %1184 = vmatprep.subr.bf16.mxu0 %v1358_v5  ;;  %s1363_s22 = smov (!%p1114_p0), 64   ;;  %s1365_s24 = smov (!%p1114_p0), 32  }
  0x55   : > { %s1795_s4 = smov (!%p502_p10, %s501_s4), 0 }
  0x56   : > { %p511_p12 = scmp.gt.s32.totalorder %s510_s5, 0  ;;  %p1089_p13 = scmp.lt.s32.totalorder %s510_s5, 127 }
  0x57   : > { %s1797_s4 = smov (!%p1084_p11, %s1795_s4), 127 }
  0x58   : > { %s1799_s5 = smov (!%p511_p12, %s510_s5), 0  ;;  %s506_s20 = scalar_lea.vmem %s1736_s3, %s1797_s4 }
  0x59   : > { %v507_v17 = vld [vmem:[%s506_s20] sm:$0x1]  ;;  %s1801_s5 = smov (!%p1089_p13, %s1799_s5), 127 }
  0x5a   : > { %508 = vst.msk [vmem:[#allocation4 + $0x6] sm:$0x1] %vm453_vm3, %v507_v17  ;;  %s515_s1 = scalar_lea.vmem %s1736_s3, %s1801_s5  ;;  %v1257_v17 = vld [vmem:[%s1743_s10 + $0x8] sm:$0xff]  }
  0x5b   : > { %v516_v18 = vld [vmem:[%s515_s1] sm:$0x1]  ;;  %1185 = vmatpush3.bf16.msra.mxu0 %v1257_v17  ;;  %s1364_s1 = smov (!%p1114_p0), 96  }
  0x5c   : > { %517 = vst.msk [vmem:[#allocation4 + $0x7] sm:$0x1] %vm453_vm3, %v516_v18 }
  0x63   : > { %v518_v19 = vld [vmem:[#allocation4] sm:$0xff] }
  0x64   : > { %v521_v20 = vpack.c.bf16 %v518_v19, %v518_v19 }
  0x66   : > { %1163 = vmatmul.mubr.msk.bf16.vlgmr.msra.gmra.mrb[0].mxu1 %vm543_vm2, %v521_v20 }
  0x67   : > { %1178 = vmatprep.mubr.msk.bf16.mxu1 %vm1359_vm1, %v1358_v5  ;;  %1175 = vmatpush3.bf16.msra.mxu1 %v1253_v45 }
  0x68   : > { %1176 = vmatprep.subr.bf16.mxu1 %v1358_v5 }
  0x6b   : > { %1177 = vmatpush3.bf16.msra.mxu1 %v1255_v47 }
 0x119   : > { %v581_v21 = vpop.f32.mrb[0].mxu0 }
 0x11a   : > { %v1156_v22 = vpop.f32.mrb[1].mxu0 }
 0x11b   : > { %v584_v23 = vpop.f32.mrb[2].mxu0 }
 0x11c   : > { %v1157_v24 = vpop.f32.mrb[3].mxu0 }
 0x121   : > { %v751_v55 = vpop.f32.mrb[4].mxu0 }
 0x122   : > { %v1172_v56 = vpop.f32.mrb[5].mxu0 }
 0x123   : > { %v754_v57 = vpop.f32.mrb[6].mxu0 }
 0x124   : > { %v1173_v58 = vpop.f32.mrb[7].mxu0 }
 0x139   : > { %v636_v25 = vpop.f32.mrb[0].mxu1 }
 0x13a   : > { %v637_v27 = vadd.f32 %v636_v25, %v581_v21  ;;  %v1164_v28 = vpop.f32.mrb[1].mxu1  ;;  %v1110_v25 = vld [vmem:[%s1744_s11] ss:$0 sm:$0xff] }
 0x13b   : > { %v639_v29 = vpop.f32.mrb[2].mxu1 }
 0x13c   : > { %v649_v30 = vadd.f32 %v1100_v26, %v637_v27  ;;  %v1165_v31 = vpop.f32.mrb[3].mxu1 }
 0x13e   : > { %1258 = vtanh.f32 %v649_v30  ;;  %v1101_v34 = vmul.f32 -1.442695, %v649_v30 }
 0x140   : > { %1260 = vpow2.f32 %v1101_v34 }
 0x148   : > { %v1259_v32 = vpop.eup %1258 }
 0x149   : > { %663 = vrot.lane.b32.xlu0 %v1259_v32, %s1360_s2 }
 0x14a   : > { %v1261_v35 = vpop.eup %1260 }
 0x14b   : > { %v653_v36 = vadd.f32 1.0, %v1261_v35 }
 0x14d   : > { %658 = vrot.lane.b32.xlu0 %v520_v33, %s1361_s30  ;;  %1262 = vrcp.f32 %v653_v36 }
 0x157   : > { %v1263_v37 = vpop.eup %1262 }
 0x1bb   : > { %v664_v38 = vpop.permute.xlu0 %663 }
 0x1bc   : > { %v666_v39 = vmul.f32 %v1263_v37, %v664_v38 }
 0x1be   : > { %668 = vrot.lane.b32.xlu1 %v666_v39, %s1361_s30 }
 0x1bf   : > { %v659_v40 = vpop.permute.xlu0 %658 }
 0x1c0   : > { %v661_v41 = vmul.f32 %v1263_v37, %v659_v40 }
 0x230   : > { %v669_v42 = vpop.permute.xlu1 %668 }
 0x231   : > { %v1623_v43 = vadd.f32 %v669_v42, %v661_v41 }
 0x233   : > { %1264 = vtanh.f32 %v1623_v43 }
 0x23d   : > { %v1265_v50 = vpop.eup %1264 }
 0x23e   : > { %674 = vrot.lane.b32.xlu1 %v1265_v50, %s1360_s2 }
 0x2b0   : > { %v675_v51 = vpop.permute.xlu1 %674 }
 0x2b1   : > { %v677_v52 = vmul.f32 %v1263_v37, %v675_v51 }
 0x2b3   : > { %v692_v53 = vpack.c.bf16 %v677_v52, %v677_v52 }
 0x2b5   : > { %758 = vrot.lane.b32.xlu0 %v692_v53, %s1361_s30 }
 0x2b9   : > { %831 = vrot.lane.b32.xlu0 %v691_v54, %s1361_s30 }
 0x327   : > { %v759_v59 = vpop.permute.xlu0 %758 }
 0x328   : > { %1179 = vmatmul.mubr.msk.bf16.vlgmr.msra.gmra.mrb[4].mxu1 %vm543_vm2, %v759_v59 }
 0x32b   : > { %v832_v11 = vpop.permute.xlu0 %831 }
 0x3fb   : > { %v809_v60 = vpop.f32.mrb[4].mxu1 }
 0x3fc   : > { %v810_v62 = vadd.f32 %v809_v60, %v751_v55  ;;  %v1180_v63 = vpop.f32.mrb[5].mxu1 }
 0x3fd   : > { %v812_v0 = vpop.f32.mrb[6].mxu1 }
 0x3fe   : > { %v822_v1 = vadd.f32 %v1108_v61, %v810_v62  ;;  %v1181_v2 = vpop.f32.mrb[7].mxu1 }
 0x400   : > { %1266 = vtanh.f32 %v822_v1  ;;  %v1109_v4 = vmul.f32 -1.442695, %v822_v1 }
 0x402   : > { %1268 = vpow2.f32 %v1109_v4 }
 0x40a   : > { %v1267_v3 = vpop.eup %1266 }
 0x40b   : > { %836 = vrot.lane.b32.xlu1 %v1267_v3, %s1360_s2 }
 0x40c   : > { %v1269_v6 = vpop.eup %1268 }
 0x40d   : > { %v826_v7 = vadd.f32 1.0, %v1269_v6 }
 0x40f   : > { %1270 = vrcp.f32 %v826_v7 }
 0x419   : > { %v1271_v8 = vpop.eup %1270 }
 0x41a   : > { %v834_v12 = vmul.f32 %v1271_v8, %v832_v11 }
 0x47d   : > { %v837_v9 = vpop.permute.xlu1 %836 }
 0x47e   : > { %v839_v10 = vmul.f32 %v1271_v8, %v837_v9 }
 0x480   : > { %841 = vrot.lane.b32.xlu1 %v839_v10, %s1361_s30 }
 0x4f2   : > { %v842_v13 = vpop.permute.xlu1 %841 }
 0x4f3   : > { %v844_v14 = vadd.f32 %v842_v13, %v834_v12 }
 0x4f5   : > { %1272 = vtanh.f32 %v844_v14 }
 0x4ff   : > { %v1273_v15 = vpop.eup %1272 }
 0x500   : > { %847 = vrot.lane.b32.xlu0 %v1273_v15, %s1360_s2  ;;  %s1362_s2 = smov 96  }
 0x504   : > { %679 = vrot.lane.b32.xlu0 %v677_v52, %s1361_s30 }
 0x572   : > { %v848_v18 = vpop.permute.xlu0 %847 }
 0x573   : > { %v850_v19 = vmul.f32 %v1271_v8, %v848_v18 }
 0x575   : > { %v861_v20 = vpack.c.bf16 %v850_v19, %v850_v19  ;;  %852 = vrot.lane.b32.xlu0 %v850_v19, %s1361_s30 }
 0x576   : > { %v680_v21 = vpop.permute.xlu0 %679 }
 0x577   : > { %682 = vst.msk [vmem:[#allocation2] sm:$0xff] %vm543_vm2, %v680_v21  ;;  %874 = vrot.lane.b32.xlu1 %v861_v20, %s1361_s30  ;;  %s1764_s30 = scalar_lea.vmem [#allocation8], %s1507_s16 }
 0x57b   : > { %684 = vrot.lane.b32.xlu1 %v1623_v43, %s1362_s2 }
 0x57e   : > { %v936_v33 = vld [vmem:[#allocation2] sm:$0xff] (!%p1114_p0) }
 0x57f   : > { %857 = vrot.lane.b32.xlu1 %v844_v14, %s1362_s2  ;;  %937 = vst.msk [vmem:[%s1746_s13] sm:$0xff] (!%p1114_p0), %vm543_vm2, %v936_v33 }
 0x5e7   : > { %v853_v22 = vpop.permute.xlu0 %852 }
 0x5e8   : > { %855 = vst.msk [vmem:[#allocation2 + $0x8] sm:$0xff] %vm543_vm2, %v853_v22 }
 0x5e9   : > { %v875_v5 = vpop.permute.xlu1 %874 }
 0x5ea   : > { %1187 = vmatmul.mubr.msk.bf16.vlgmr.msra.gmra.mrb[8].mxu0 %vm543_vm2, %v875_v5 }
 0x5ed   : > { %v685_v23 = vpop.permute.xlu1 %684 }
 0x5ee   : > { %687 = vst.msk [vmem:[#allocation3] sm:$0xff] %vm543_vm2, %v685_v23 }
 0x5ef   : > { %v945_v34 = vld [vmem:[#allocation2 + $0x8] sm:$0xff] (!%p1114_p0) }
 0x5f1   : > { %v858_v24 = vpop.permute.xlu1 %857 }
 0x5f2   : > { %860 = vst.msk [vmem:[#allocation3 + $0x8] sm:$0xff] %vm543_vm2, %v858_v24 }
 0x5f5   : > { %v938_v31 = vld [vmem:[#allocation3] sm:$0xff] (!%p1114_p0) }
 0x5f6   : > { %940 = vrot.lane.b32.xlu0 (!%p1114_p0), %v938_v31, %s1363_s22 }
 0x5f9   : > { %v952_v32 = vld [vmem:[#allocation3 + $0x8] sm:$0xff] (!%p1114_p0) }
 0x5fa   : > { %954 = vrot.lane.b32.xlu1 (!%p1114_p0), %v952_v32, %s1364_s1  ;;  %947 = vrot.lane.b32.xlu0 (!%p1114_p0), %v945_v34, %s1365_s24 }
 0x668   : > { %v941_v35 = vpop.permute.xlu0 (!%p1114_p0), %940 }
 0x669   : > { %944 = vst.msk [vmem:[%s1746_s13] sm:$0xff] (!%p1114_p0), %vm943_vm4, %v941_v35 }
 0x66c   : > { %v955_v36 = vpop.permute.xlu1 (!%p1114_p0), %954  ;;  %v948_v37 = vpop.permute.xlu0 (!%p1114_p0), %947 }
 0x66d   : > { %951 = vst.msk [vmem:[%s1746_s13] sm:$0xff] (!%p1114_p0), %vm950_vm5, %v948_v37 }
 0x66e   : > { %958 = vst.msk [vmem:[%s1746_s13] sm:$0xff] (!%p1114_p0), %vm957_vm6, %v955_v36 }
 0x6ba   : > { %935 = sbr.rel (%p1114_p0) target bundleno = 1729 (0x6c1), region = 80 }
 0x6bd   : > { %v925_v26 = vpop.f32.mrb[8].mxu0 }
 0x6be   : > { %v926_v27 = vadd.f32 %v1110_v25, %v925_v26  ;;  %v1188_v28 = vpop.f32.mrb[9].mxu0 }
 0x6bf   : > { %v928_v29 = vpop.f32.mrb[10].mxu0 }
 0x6c0   : > { %931 = vst [vmem:[%s1764_s30] sm:$0xff] %v926_v27  ;;  %v1189_v30 = vpop.f32.mrb[11].mxu0 }
 0x6c1 PF: > { %s1693_s22 = scalar_lea.hbm %s1745_s12, %s1539_s21  ;;  %s1765_s1 = scalar_lea.vmem [#allocation8], %s1507_s16 }
 0x6c2   : > { %s973_s4 = sshll.u32 %s1765_s1, 4  ;;  %s1766_s23 = sand.u32 1, %s1347_s26   ;;  %s974_s4 = int_to_ptr.vmem [resolvable:$true] %s973_s4 }
 0x6c3   : > { %s960_s24 = scalar_lea.sflag [#allocation6], %s1766_s23  ;;  %s1289_s5 = scalar_lea.vmem %s974_s4, 128 }
 0x6c4   : > { %p1290_p1 = scmp.ne.s32.totalorder %s974_s4, %s1289_s5  ;;  %s1366_s29 = smov [#allocation8]  }
 0x6c5   : > { %s1293_s17 = sshll.u32 %s1366_s29, 4  ;;  %s1294_s17 = int_to_ptr.vmem [resolvable:$false] %s1293_s17 }
 0x6c6   : > { %p1291_p2 = pnand %p1290_p1, %p1475_p5  ;;  %s1295_s15 = scalar_lea.vmem %s1294_s17, 256 }
 0x6c7   : > { %p1296_p4 = scmp.lt.s32.totalorder %s974_s4, %s1294_s17  ;;  %p1297_p7 = scmp.lt.s32.totalorder %s1295_s15, %s1289_s5 }
 0x6c8   : > { %p1292_p3 = pneg %p1291_p2 }
 0x6c9   : > { %p1298_p8 = por %p1297_p7, %p1296_p4 }
 0x6cb   : > { %p1299_p9 = pnand %p1298_p8, %p1292_p3 }
 0x6cd   : > { %1302 = shalt.err (!%p1299_p9)
}
 0x6ce   : > { %s1303_s16 = scalar_lea.hbm %s1693_s22, 128  ;;  %s1307_s20 = scalar_lea.hbm %s1745_s12, 768 }
 0x6cf   : > { %p1304_p10 = scmp.ne.s32.totalorder %s1693_s22, %s1303_s16  ;;  %p1308_p13 = scmp.lt.u32.totalorder %s1693_s22, %s1745_s12 }
 0x6d0   : > { %p1309_p0 = scmp.lt.u32.totalorder %s1307_s20, %s1303_s16  ;;  %p1311_p2 = scmp.lt.u32.totalorder %s1303_s16, %s1693_s22 }
 0x6d1   : > { %p1305_p11 = pnand %p1304_p10, %p1475_p5 }
 0x6d2   : > { %p1310_p1 = por %p1309_p0, %p1308_p13 }
 0x6d3   : > { %p1306_p12 = pneg %p1305_p11 }
 0x6d4   : > { %p1312_p3 = por %p1311_p2, %p1310_p1 }
 0x6d6   : > { %p1313_p4 = pnand %p1312_p3, %p1306_p12 }
 0x6d8   : > { %1316 = shalt.err (!%p1313_p4)
}
 0x6d9   : > { %1194 = dma.vmem_to_hbm [thread:$0]  (%p1475_p5), %s974_s4, 128, %s1693_s22, %s960_s24  }
 0x6da PF: > { %p1206_p7 = scmp.ge.s32.totalorder %s1355_s28, 2  ;;  %s991_s1 = sand.u32 1, %s1343_s25  }
 0x6db   : > { %s992_s23 = scalar_lea.sflag [#allocation6], %s991_s1 }
 0x6dc   : > { %p1201_p8 = pnand %p1206_p7, %p1479_p6 }
 0x6de   : > { %1338 = dma.done.wait (!%p1201_p8), %s992_s23, 128  }
 0x6df   : > { %1340 = vsyncadd (!%p1201_p8), %s992_s23, 4294967168  ;;  %s1767_s5 = sld [smem:[#allocation11_spill]]  ;;  %p25_p9 = scmp.ge.s32.totalorder %s1462_s14, 8  }
 0x6e0   : > { %s1768_s25 = smov %s1347_s26  ;;  %s1769_s26 = smov %s1351_s27 }
 0x6e1   : > { %s1771_s28 = smov %s1462_s14  ;;  %27 = sbr.rel (!%p25_p9) target bundleno = 10 (0xa), region = 131 }
 0x6e5   : > { %s1770_s27 = smov %s1767_s5 }
 0x6e8   :  { %997 = vsyncpa [#allocation6], 1 }
 0x6e9   :  { %999 = vsyncpa [#allocation6 + $0x1], 1 }
 0x6ea   :  { %1000 = vsyncpa [#allocation7], 1 }
 0x6eb   :  { %1002 = vsyncpa [#allocation7 + $0x1], 1 }

</bundles_post_ra>
